<compile_context>
chip_gen: v7x
topology: tpu7x:2x2x1
jax: 0.10.0
libtpu: 0.0.40
codegen_flags: <defaults>
</compile_context>

<pallas_src>
import math
from functools import partial

import jax
import jax.numpy as jnp
from jax.experimental import pallas as pl
from jax.experimental.pallas import tpu as pltpu


_LANES = 128            # vreg lane width
_TR_MAX = 4096          # rows of 128 lanes per tile -> 2 MiB per f32 buffer
_TILE_BYTES = 2 << 20   # ~2 MiB per buffer target for the fallback path
_VMEM_LIMIT = 32 << 20  # raise v5e's 16 MiB scoped default; fine on v6e/v7x
_BYPASS_BYTES = 1 << 20 # below ~1 MiB a fused XLA add beats the launch cost


def build_pe_table(d_model: int, max_len: int = 5000) -> jnp.ndarray:
    """Sin/cos positional-encoding table, shape (max_len, d_model_pad).

    Matches the CLFormer PyTorch module exactly: d_model is padded to even
    *before* div_term is computed, sin fills even columns, cos odd columns.
    """
    d_pad = d_model + 1 if d_model % 2 != 0 else d_model
    position = jnp.arange(0, max_len, dtype=jnp.float32)[:, None]
    div_term = jnp.exp(
        jnp.arange(0, d_pad, 2, dtype=jnp.float32) * (-math.log(10000.0) / d_pad)
    )
    angles = position * div_term                              # (max_len, d_pad//2)
    pe = jnp.zeros((max_len, d_pad), dtype=jnp.float32)
    pe = pe.at[:, 0::2].set(jnp.sin(angles))
    pe = pe.at[:, 1::2].set(jnp.cos(angles))
    return pe


def _pe_add_kernel(x_ref, pe_ref, o_ref):
    # Identically-shaped 2-D tiles (batch dim squeezed): plain elementwise add.
    o_ref[...] = x_ref[...] + pe_ref[...]


def _launch(x_view: jnp.ndarray, pe_view: jnp.ndarray, tile_rows: int) -> jnp.ndarray:
    """x_view: (B, ROWS, COLS); pe_view: (ROWS, COLS); tile = (tile_rows, COLS)."""
    B, ROWS, COLS = x_view.shape
    n_row_tiles = pl.cdiv(ROWS, tile_rows)     # last tile may be partial (masked)
    itemsize = jnp.dtype(x_view.dtype).itemsize
    cost = pl.CostEstimate(
        flops=B * ROWS * COLS,
        transcendentals=0,
        bytes_accessed=(2 * B + 1) * ROWS * COLS * itemsize,
    )
    return pl.pallas_call(
        _pe_add_kernel,
        out_shape=jax.ShapeDtypeStruct(x_view.shape, x_view.dtype),
        grid_spec=pl.GridSpec(
            # Row tiles outer, batch INNERMOST: pe's block index is constant
            # across consecutive steps, so each pe tile is fetched once, not
            # once per batch element.
            grid=(n_row_tiles, B),
            in_specs=[
                # batch dim squeezed out of the kernel view
                pl.BlockSpec((None, tile_rows, COLS), lambda r, b: (b, r, 0)),
                pl.BlockSpec((tile_rows, COLS), lambda r, b: (r, 0)),
            ],
            out_specs=pl.BlockSpec((None, tile_rows, COLS), lambda r, b: (b, r, 0)),
        ),
        compiler_params=pltpu.CompilerParams(
            dimension_semantics=("parallel", "parallel"),
            vmem_limit_bytes=_VMEM_LIMIT,
        ),
        cost_estimate=cost,
        # x += pe: the output reuses x's HBM buffer (paired with donation below).
        input_output_aliases={0: 0},
    )(x_view, pe_view)


@partial(jax.jit, static_argnames=("force_pallas",), donate_argnums=(0,))
def positional_encoding_forward(x: jnp.ndarray, pe_table: jnp.ndarray,
                                *, force_pallas: bool = False) -> jnp.ndarray:
    """x: (B, S, D); pe_table: (max_len, d_pad).  Returns x + pe[:S, :D]."""
    B, S, D = x.shape
    pe_slice = pe_table[:S, :D].astype(x.dtype)       # (S, D), static slice, tiny

    itemsize = jnp.dtype(x.dtype).itemsize
    if not force_pallas and x.size * itemsize < _BYPASS_BYTES:
        # Tiny problem: a fused XLA add beats the fixed pallas_call overhead.
        return x + pe_slice[None, :, :]

    N = S * D
    if N % _LANES == 0:
        # Lane-dense path: free bitcast reshape, no pad, no output slice.
        R = N // _LANES
        # Whole extent as one block when it fits (always legal), else a
        # 4096-row tile (multiple of 32 -> sublane-aligned for any dtype);
        # a non-divisible remainder is handled by grid-edge masking.
        tile_rows = R if R <= _TR_MAX else _TR_MAX
        out = _launch(x.reshape(B, R, _LANES), pe_slice.reshape(R, _LANES), tile_rows)
        return out.reshape(B, S, D)

    # Fallback (S*D not a multiple of 128): shape-preserving tiling with the
    # full D as the lane dim.  Less lane-dense, but still zero extra HBM
    # passes, which dominates on this bandwidth-bound op.
    ts_max = max(8, (_TILE_BYTES // (D * itemsize)) // 32 * 32)
    tile_rows = S if S <= ts_max else ts_max
    return _launch(x, pe_slice, tile_rows)


if __name__ == "__main__":
    d_model = 16
    max_len = 5000
    pe_table = build_pe_table(d_model, max_len)

    # Case 1: the module's natural small shape (batch=2, seq=8, d_model=16).
    # S*D = 128 -> lane-dense path, grid (1, 2).
    B, S = 2, 8
    x = jax.random.normal(jax.random.PRNGKey(0), (B, S, d_model), dtype=jnp.float32)
    ref = x + pe_table[None, :S, :d_model]      # computed before x is donated
    out = jax.block_until_ready(
        positional_encoding_forward(x, pe_table, force_pallas=True))
    assert out.shape == (B, S, d_model)
    assert jnp.allclose(out, ref, atol=1e-6), "mismatch vs reference (lane-dense)"

    # Case 2: S*D = 4800 not a multiple of 128 -> shape-preserving fallback path.
    B2, S2 = 2, 300
    x2 = jax.random.normal(jax.random.PRNGKey(1), (B2, S2, d_model), dtype=jnp.float32)
    ref2 = x2 + pe_table[None, :S2, :d_model]   # computed before x2 is donated
    out2 = jax.block_until_ready(
        positional_encoding_forward(x2, pe_table, force_pallas=True))
    assert out2.shape == (B2, S2, d_model)
    assert jnp.allclose(out2, ref2, atol=1e-6), "mismatch vs reference (fallback)"

    print("KERNEL_OK")
</pallas_src>

<mosaic_0001>
module attributes {stable_mosaic.version = 11 : i64} {
  func.func @_pe_add_kernel(%arg0: i32, %arg1: i32, %arg2: memref<1x1x128xf32, #tpu.memory_space<vmem>>, %arg3: memref<1x128xf32, #tpu.memory_space<vmem>>, %arg4: memref<1x1x128xf32, #tpu.memory_space<vmem>>) attributes {dimension_semantics = [#tpu.dimension_semantics<parallel>, #tpu.dimension_semantics<parallel>], iteration_bounds = array<i64: 1, 2>, scalar_prefetch = 0 : i64, scratch_operands = 0 : i64, tpu.core_type = #tpu.core_type<tc>, window_params = [{transform_indices = @transform_0, window_bounds = array<i64: 1, 1, 128>}, {transform_indices = @transform_1, window_bounds = array<i64: 1, 128>}, {transform_indices = @transform_2, window_bounds = array<i64: 1, 1, 128>}]} {
    %c0 = arith.constant 0 : index
    %c0_0 = arith.constant 0 : index
    %c0_1 = arith.constant 0 : index
    %0 = vector.load %arg2[%c0, %c0_0, %c0_1] : memref<1x1x128xf32, #tpu.memory_space<vmem>>, vector<1x1x128xf32>
    %1 = vector.shape_cast %0 : vector<1x1x128xf32> to vector<1x128xf32>
    %c0_2 = arith.constant 0 : index
    %c0_3 = arith.constant 0 : index
    %2 = vector.load %arg3[%c0_2, %c0_3] : memref<1x128xf32, #tpu.memory_space<vmem>>, vector<1x128xf32>
    %3 = arith.addf %1, %2 : vector<1x128xf32>
    %c0_4 = arith.constant 0 : index
    %c0_5 = arith.constant 0 : index
    %c0_6 = arith.constant 0 : index
    %4 = vector.load %arg4[%c0_4, %c0_5, %c0_6] : memref<1x1x128xf32, #tpu.memory_space<vmem>>, vector<1x1x128xf32>
    %5 = vector.shape_cast %4 : vector<1x1x128xf32> to vector<1x128xf32>
    %6 = vector.shape_cast %3 : vector<1x128xf32> to vector<1x1x128xf32>
    tpu.vector_store %arg4[%c0_4, %c0_5, %c0_6], %6 {strides = array<i32>} : memref<1x1x128xf32, #tpu.memory_space<vmem>>, vector<1x1x128xf32>,
    return
  }
  func.func @transform_0(%arg0: i32, %arg1: i32) -> (i32, i32, i32) {
    %c0_i32 = arith.constant 0 : i32
    %c0_i32_0 = arith.constant 0 : i32
    return %arg1, %arg0, %c0_i32 : i32, i32, i32
  }
  func.func @transform_1(%arg0: i32, %arg1: i32) -> (i32, i32) {
    %c0_i32 = arith.constant 0 : i32
    %c0_i32_0 = arith.constant 0 : i32
    return %arg0, %c0_i32 : i32, i32
  }
  func.func @transform_2(%arg0: i32, %arg1: i32) -> (i32, i32, i32) {
    %c0_i32 = arith.constant 0 : i32
    %c0_i32_0 = arith.constant 0 : i32
    return %arg1, %arg0, %c0_i32 : i32, i32, i32
  }
}

</mosaic_0001>

<bundles_post_ra>
// kernel: positional_encoding_forward.1
= control target key start
LH: loop header
LB: loop body
LE: loop exit
PB: predicated region body
PF: predicated region fallthrough
CT: control target
= control target key end

     0   :  { %s305_s9 = smov 0   ;;  %s309_s10 = smov 0   ;;  %s341_s0 = inlined_call_operand.vmem [shape: f32[2,1,128], index: 0, kind: input, shape index: {}, may-alias: {0,2}]   ;;  %s342_s1 = inlined_call_operand.vmem [shape: f32[1,128], index: 1, kind: input, shape index: {}]   ;;  %s343_s2 = inlined_call_operand.vmem [shape: f32[2,1,128], index: 2, kind: output, shape index: {}, may-alias: {0,2}]  }
   0x1   :  { %s313_s11 = smov 0  }
   0x2 LB: > { %s21_s12 = sadd.s32 1, %s311_s10  ;;  %p266_p0 = scmp.ge.s32.totalorder %s315_s11, 1  ;;  %s315_s11 = sphi %s313_s11, %s12_s11   ;;  %s311_s10 = sphi %s309_s10, %s310_s10   ;;  %s307_s9 = sphi %s305_s9, %s306_s9  }
   0x3   : > { %p22_p1 = scmp.ge.s32.totalorder %s21_s12, 2  ;;  %p137_p2 = scmp.lt.s32.totalorder %s315_s11, 3 }
   0x5   : > { %s345_s12 = smov (%p22_p1, %s21_s12), 0  ;;  %p138_p3 = pnand %p266_p0, %p137_p2 }
   0x6   : > { %p164_p4 = scmp.lt.s32.totalorder (!%p138_p3), %s307_s9, 1  ;;  %v180_v0 = vld [vmem:[%s342_s1] sm:$0x1] (!%p138_p3) }
   0x7   : > { %141 = sbr.rel (%p138_p3) target bundleno = 20 (0x14), region = 28 }
   0xe   : > { %s347_s9 = smov (!%p164_p4, %s307_s9), 1 }
   0xf   : > { %s169_s17 = scalar_lea.vmem %s341_s0, %s347_s9  ;;  %s178_s20 = scalar_lea.vmem %s343_s2, %s347_s9 }
  0x10   : > { %v179_v1 = vld [vmem:[%s169_s17] sm:$0x1] }
  0x11   : > { %v181_v2 = vadd.f32 %v180_v0, %v179_v1 }
  0x13   : > { %182 = vst [vmem:[%s178_s20] sm:$0x1] %v181_v2 }
  0x14 PF: > { %s12_s11 = sadd.s32 1, %s315_s11   ;;  %s306_s9 = smov %s311_s10  }
  0x15   : > { %p9_p5 = scmp.ge.s32.totalorder %s12_s11, 4   ;;  %s310_s10 = smov %s345_s12  }
  0x17   :  { %11 = sbr.rel (!%p9_p5) target bundleno = 2 (0x2), region = 61 }

</bundles_post_ra>
